<compile_context>
chip_gen: v7x
topology: tpu7x:2x2x1
jax: 0.10.0
libtpu: 0.0.40
codegen_flags: <defaults>
</compile_context>

<pallas_src>
import jax
import jax.numpy as jnp
from jax.experimental import pallas as pl
from jax.experimental.pallas import tpu as pltpu

FPAD = 128  # per-offset weight block padded to one full lane group


def cnn_kernel(emb_ref, wall_ref, b1_ref, b2_ref,
               wfc1_ref, wfc2_ref, bfc_ref, out_ref):
    """Whole CNN forward (convs + maxpool + fc + sigmoid) in one invocation.

    Refs:
      emb_ref  : (B, S, E)        embedded tokens
      wall_ref : (E, 6*FPAD)      all conv projections stacked along lanes:
                                  blocks [0,1]   = conv1 row offsets 0,1
                                  blocks [2..5]  = conv2 row offsets 0..3
                                  (each block zero-padded F -> FPAD lanes)
      b1_ref   : (1, F)           conv1 bias
      b2_ref   : (1, F)           conv2 bias
      wfc1_ref : (1, F)           fc1 weight columns acting on conv1 features
      wfc2_ref : (1, F)           fc1 weight columns acting on conv2 features
      bfc_ref  : (1, 1)           fc1 bias
      out_ref  : (B, 1)           sigmoid(fc1(cat(maxpool(conv1), maxpool(conv2))))
    """
    B, S, E = emb_ref.shape
    F = b1_ref.shape[1]

    emb2d = emb_ref[...].reshape(B * S, E)                       # (B*S, E)

    # Single MXU matmul covering every per-offset projection of both convs.
    big = jnp.dot(emb2d, wall_ref[...],
                  preferred_element_type=jnp.float32)            # (B*S, 6*FPAD)
    big = big.reshape(B, S, 6 * FPAD)                            # (B, S, 6*FPAD)

    def block(k):
        # Lane-aligned slice of projection block k, trimmed to the F valid lanes.
        return big[:, :, k * FPAD:k * FPAD + F]                  # (B, S, F)

    # ---- conv1 == Conv2d(1, F, (2, E)): shifted add of offsets 0,1
    c1 = block(0)[:, 0:S - 1, :] + block(1)[:, 1:S, :]           # (B, S-1, F)
    m1 = jnp.max(c1, axis=1) + b1_ref[...]                       # (B, F)  bias after max

    # ---- conv2 == Conv2d(1, F, (4, E)): shifted add of offsets 0..3
    c2 = (block(2)[:, 0:S - 3, :] + block(3)[:, 1:S - 2, :]
          + block(4)[:, 2:S - 1, :] + block(5)[:, 3:S, :])       # (B, S-3, F)
    m2 = jnp.max(c2, axis=1) + b2_ref[...]                       # (B, F)

    # ---- fc1 (Linear(2F, 1)) as a VPU lane reduction, then sigmoid
    logit = (jnp.sum(m1 * wfc1_ref[...], axis=-1, keepdims=True)
             + jnp.sum(m2 * wfc2_ref[...], axis=-1, keepdims=True)
             + bfc_ref[...])                                     # (B, 1)
    out_ref[...] = jax.nn.sigmoid(logit)


def cnn_forward(x_tokens, params):
    """Full forward pass. Embedding gather is JAX glue; convs, max-pool,
    final linear and sigmoid all run inside the single Pallas kernel."""
    emb = params["embedding"][x_tokens].astype(jnp.float32)      # (B, S, E) gather
    B, S, E = emb.shape
    F = params["b_conv1"].shape[0]

    # PyTorch conv weight (F, 1, K, E) -> one (E, F) matrix per kernel-row
    # offset, each zero-padded to (E, FPAD) and stacked along the lane axis
    # so every in-kernel slice is (8,128)-tile aligned.
    w1 = params["w_conv1"][:, 0, :, :]                           # (F, 2, E)
    w2 = params["w_conv2"][:, 0, :, :]                           # (F, 4, E)
    blocks = [jnp.transpose(w1[:, k, :]) for k in range(2)]      # 2 x (E, F)
    blocks += [jnp.transpose(w2[:, k, :]) for k in range(4)]     # 4 x (E, F)
    wall = jnp.concatenate(
        [jnp.pad(blk, ((0, 0), (0, FPAD - F))) for blk in blocks], axis=1
    )                                                            # (E, 6*FPAD)

    b1 = params["b_conv1"].reshape(1, F)
    b2 = params["b_conv2"].reshape(1, F)
    # fc1 weight (1, 2F): columns [0:F] act on conv1 features, [F:2F] on conv2.
    wfc1 = params["w_fc"][:, 0:F]
    wfc2 = params["w_fc"][:, F:2 * F]
    bfc = params["b_fc"].reshape(1, 1)

    vmem = pl.BlockSpec(memory_space=pltpu.MemorySpace.VMEM)
    return pl.pallas_call(
        cnn_kernel,
        out_shape=jax.ShapeDtypeStruct((B, 1), jnp.float32),
        in_specs=[vmem] * 7,
        out_specs=vmem,
    )(emb, wall, b1, b2, wfc1, wfc2, bfc)


def cnn_reference(x_tokens, params):
    """Pure-JAX reference matching the PyTorch CNN forward exactly."""
    emb = params["embedding"][x_tokens].astype(jnp.float32)      # (B, S, E)
    B, S, E = emb.shape

    def conv_fullwidth(x, w, b):                 # w: (F, 1, K, E), b: (F,)
        F_, _, K, _ = w.shape
        w_mat = w.reshape(F_, K * E)
        rows = []
        for t in range(S - K + 1):
            window = x[:, t:t + K, :].reshape(B, K * E)
            rows.append(window @ w_mat.T + b)    # (B, F)
        return jnp.stack(rows, axis=1)           # (B, S-K+1, F)

    c1 = conv_fullwidth(emb, params["w_conv1"], params["b_conv1"])
    c2 = conv_fullwidth(emb, params["w_conv2"], params["b_conv2"])
    feat = jnp.concatenate([jnp.max(c1, axis=1), jnp.max(c2, axis=1)], axis=1)
    logit = feat @ params["w_fc"].T + params["b_fc"]
    return jax.nn.sigmoid(logit)


if __name__ == "__main__":
    # Small, deterministic shapes (S must be >= 4 for the (4, E) conv).
    B, S = 4, 16                # batch, sequence length
    V, E, F = 64, 32, 50        # vocab, embedding dim, filters per conv

    key = jax.random.PRNGKey(0)
    ks = jax.random.split(key, 8)
    k1 = 1.0 / jnp.sqrt(2.0 * E)
    k2 = 1.0 / jnp.sqrt(4.0 * E)
    kf = 1.0 / jnp.sqrt(2.0 * F)

    params = {
        "embedding": jax.random.normal(ks[0], (V, E), jnp.float32),   # vocab.vectors
        "w_conv1": jax.random.uniform(ks[1], (F, 1, 2, E), jnp.float32, -k1, k1),
        "b_conv1": jax.random.uniform(ks[2], (F,), jnp.float32, -k1, k1),
        "w_conv2": jax.random.uniform(ks[3], (F, 1, 4, E), jnp.float32, -k2, k2),
        "b_conv2": jax.random.uniform(ks[4], (F,), jnp.float32, -k2, k2),
        "w_fc": jax.random.uniform(ks[5], (1, 2 * F), jnp.float32, -kf, kf),
        "b_fc": jax.random.uniform(ks[6], (1,), jnp.float32, -kf, kf),
    }
    x_tokens = jax.random.randint(ks[7], (B, S), 0, V, dtype=jnp.int32)

    out = jax.block_until_ready(cnn_forward(x_tokens, params))
    ref = cnn_reference(x_tokens, params)

    assert out.shape == (B, 1), out.shape
    assert jnp.allclose(out, ref, atol=1e-5, rtol=1e-5), (out, ref)

    print("KERNEL_OK")
</pallas_src>

<mosaic_0001>
module attributes {stable_mosaic.version = 11 : i64} {
  func.func @cnn_kernel(%arg0: memref<4x16x32xf32, #tpu.memory_space<vmem>>, %arg1: memref<32x768xf32, #tpu.memory_space<vmem>>, %arg2: memref<1x50xf32, #tpu.memory_space<vmem>>, %arg3: memref<1x50xf32, #tpu.memory_space<vmem>>, %arg4: memref<1x50xf32, #tpu.memory_space<vmem>>, %arg5: memref<1x50xf32, #tpu.memory_space<vmem>>, %arg6: memref<1x1xf32, #tpu.memory_space<vmem>>, %arg7: memref<4x1xf32, #tpu.memory_space<vmem>>) attributes {dimension_semantics = [], scalar_prefetch = 0 : i64, scratch_operands = 0 : i64, tpu.core_type = #tpu.core_type<tc>} {
    %c0 = arith.constant 0 : index
    %c0_0 = arith.constant 0 : index
    %c0_1 = arith.constant 0 : index
    %0 = vector.load %arg0[%c0, %c0_0, %c0_1] : memref<4x16x32xf32, #tpu.memory_space<vmem>>, vector<4x16x32xf32>
    %1 = vector.shape_cast %0 : vector<4x16x32xf32> to vector<64x32xf32>
    %c0_2 = arith.constant 0 : index
    %c0_3 = arith.constant 0 : index
    %2 = vector.load %arg1[%c0_2, %c0_3] : memref<32x768xf32, #tpu.memory_space<vmem>>, vector<32x768xf32>
    %cst = arith.constant dense<0.000000e+00> : vector<64x768xf32>
    %3 = tpu.matmul %1, %2, %cst {dimension_numbers = #tpu.dot_dimension_numbers<[1], [0], [0], [1], [0, 0, 1, 1], [], []>} : vector<64x32xf32>, vector<32x768xf32>, vector<64x768xf32> -> vector<64x768xf32>
    %4 = vector.shape_cast %3 : vector<64x768xf32> to vector<4x16x768xf32>
    %5 = vector.extract_strided_slice %4 {offsets = [0, 0, 0], sizes = [4, 16, 50], strides = [1, 1, 1]} : vector<4x16x768xf32> to vector<4x16x50xf32>
    %6 = vector.extract_strided_slice %5 {offsets = [0, 0, 0], sizes = [4, 15, 50], strides = [1, 1, 1]} : vector<4x16x50xf32> to vector<4x15x50xf32>
    %7 = vector.extract_strided_slice %4 {offsets = [0, 0, 128], sizes = [4, 16, 50], strides = [1, 1, 1]} : vector<4x16x768xf32> to vector<4x16x50xf32>
    %8 = vector.extract_strided_slice %7 {offsets = [0, 1, 0], sizes = [4, 15, 50], strides = [1, 1, 1]} : vector<4x16x50xf32> to vector<4x15x50xf32>
    %9 = arith.addf %6, %8 : vector<4x15x50xf32>
    %cst_4 = arith.constant dense<0xFF800000> : vector<4x50xf32>
    %10 = vector.multi_reduction <maximumf>, %9, %cst_4 [1] : vector<4x15x50xf32> to vector<4x50xf32>
    %c0_5 = arith.constant 0 : index
    %c0_6 = arith.constant 0 : index
    %11 = vector.load %arg2[%c0_5, %c0_6] : memref<1x50xf32, #tpu.memory_space<vmem>>, vector<1x50xf32>
    %12 = vector.broadcast %11 : vector<1x50xf32> to vector<4x50xf32>
    %13 = arith.addf %10, %12 : vector<4x50xf32>
    %14 = vector.extract_strided_slice %4 {offsets = [0, 0, 256], sizes = [4, 16, 50], strides = [1, 1, 1]} : vector<4x16x768xf32> to vector<4x16x50xf32>
    %15 = vector.extract_strided_slice %14 {offsets = [0, 0, 0], sizes = [4, 13, 50], strides = [1, 1, 1]} : vector<4x16x50xf32> to vector<4x13x50xf32>
    %16 = vector.extract_strided_slice %4 {offsets = [0, 0, 384], sizes = [4, 16, 50], strides = [1, 1, 1]} : vector<4x16x768xf32> to vector<4x16x50xf32>
    %17 = vector.extract_strided_slice %16 {offsets = [0, 1, 0], sizes = [4, 13, 50], strides = [1, 1, 1]} : vector<4x16x50xf32> to vector<4x13x50xf32>
    %18 = arith.addf %15, %17 : vector<4x13x50xf32>
    %19 = vector.extract_strided_slice %4 {offsets = [0, 0, 512], sizes = [4, 16, 50], strides = [1, 1, 1]} : vector<4x16x768xf32> to vector<4x16x50xf32>
    %20 = vector.extract_strided_slice %19 {offsets = [0, 2, 0], sizes = [4, 13, 50], strides = [1, 1, 1]} : vector<4x16x50xf32> to vector<4x13x50xf32>
    %21 = arith.addf %18, %20 : vector<4x13x50xf32>
    %22 = vector.extract_strided_slice %4 {offsets = [0, 0, 640], sizes = [4, 16, 50], strides = [1, 1, 1]} : vector<4x16x768xf32> to vector<4x16x50xf32>
    %23 = vector.extract_strided_slice %22 {offsets = [0, 3, 0], sizes = [4, 13, 50], strides = [1, 1, 1]} : vector<4x16x50xf32> to vector<4x13x50xf32>
    %24 = arith.addf %21, %23 : vector<4x13x50xf32>
    %cst_7 = arith.constant dense<0xFF800000> : vector<4x50xf32>
    %25 = vector.multi_reduction <maximumf>, %24, %cst_7 [1] : vector<4x13x50xf32> to vector<4x50xf32>
    %c0_8 = arith.constant 0 : index
    %c0_9 = arith.constant 0 : index
    %26 = vector.load %arg3[%c0_8, %c0_9] : memref<1x50xf32, #tpu.memory_space<vmem>>, vector<1x50xf32>
    %27 = vector.broadcast %26 : vector<1x50xf32> to vector<4x50xf32>
    %28 = arith.addf %25, %27 : vector<4x50xf32>
    %c0_10 = arith.constant 0 : index
    %c0_11 = arith.constant 0 : index
    %29 = vector.load %arg4[%c0_10, %c0_11] : memref<1x50xf32, #tpu.memory_space<vmem>>, vector<1x50xf32>
    %30 = vector.broadcast %29 : vector<1x50xf32> to vector<4x50xf32>
    %31 = arith.mulf %13, %30 : vector<4x50xf32>
    %cst_12 = arith.constant dense<0.000000e+00> : vector<4xf32>
    %32 = vector.multi_reduction <add>, %31, %cst_12 [1] : vector<4x50xf32> to vector<4xf32>
    %33 = vector.shape_cast %32 : vector<4xf32> to vector<4x1xf32>
    %c0_13 = arith.constant 0 : index
    %c0_14 = arith.constant 0 : index
    %34 = vector.load %arg5[%c0_13, %c0_14] : memref<1x50xf32, #tpu.memory_space<vmem>>, vector<1x50xf32>
    %35 = vector.broadcast %34 : vector<1x50xf32> to vector<4x50xf32>
    %36 = arith.mulf %28, %35 : vector<4x50xf32>
    %cst_15 = arith.constant dense<0.000000e+00> : vector<4xf32>
    %37 = vector.multi_reduction <add>, %36, %cst_15 [1] : vector<4x50xf32> to vector<4xf32>
    %38 = vector.shape_cast %37 : vector<4xf32> to vector<4x1xf32>
    %39 = arith.addf %33, %38 : vector<4x1xf32>
    %c0_16 = arith.constant 0 : index
    %c0_17 = arith.constant 0 : index
    %40 = vector.load %arg6[%c0_16, %c0_17] : memref<1x1xf32, #tpu.memory_space<vmem>>, vector<1x1xf32>
    %41 = vector.broadcast %40 : vector<1x1xf32> to vector<4x1xf32>
    %42 = arith.addf %39, %41 : vector<4x1xf32>
    %43 = arith.negf %42 : vector<4x1xf32>
    %44 = math.exp %43 : vector<4x1xf32>
    %cst_18 = arith.constant 1.000000e+00 : f32
    %45 = vector.broadcast %cst_18 : f32 to vector<4x1xf32>
    %46 = arith.addf %45, %44 : vector<4x1xf32>
    %47 = arith.divf %45, %46 : vector<4x1xf32>
    %c0_19 = arith.constant 0 : index
    %c0_20 = arith.constant 0 : index
    %48 = vector.load %arg7[%c0_19, %c0_20] : memref<4x1xf32, #tpu.memory_space<vmem>>, vector<4x1xf32>
    tpu.vector_store %arg7[%c0_19, %c0_20], %47 {strides = array<i32>} : memref<4x1xf32, #tpu.memory_space<vmem>>, vector<4x1xf32>,
    return
  }
}

</mosaic_0001>

<bundles_post_ra>
// kernel: tpu_custom_call.1
= control target key start
LH: loop header
LB: loop body
LE: loop exit
PB: predicated region body
PF: predicated region fallthrough
CT: control target
= control target key end

     0   :  { %s1067_s0 = inlined_call_operand.hbm [shape: f32[4,16,32], index: 0, kind: input, shape index: {}]   ;;  %s1068_s1 = inlined_call_operand.hbm [shape: f32[32,768], index: 1, kind: input, shape index: {}]   ;;  %s1069_s2 = inlined_call_operand.vmem [shape: f32[1,50], index: 2, kind: input, shape index: {}]   ;;  %s1070_s3 = inlined_call_operand.vmem [shape: f32[1,50], index: 3, kind: input, shape index: {}]   ;;  %s1071_s4 = inlined_call_operand.vmem [shape: f32[1,50], index: 4, kind: input, shape index: {}]   ;;  %s1072_s5 = inlined_call_operand.vmem [shape: f32[1,50], index: 5, kind: input, shape index: {}]   ;;  %s1073_s6 = inlined_call_operand.<no memory space> [shape: f32[1,1], index: 6, kind: input, shape index: {}]   ;;  %s1074_s7 = inlined_call_operand.vmem [shape: f32[4,1], index: 7, kind: output, shape index: {}]  }
   0x1   :  { %v12_v0 = vstv %s1073_s6 }
   0x2   :  { %13 = vst [vmem:[#allocation2] sm:$0x1] %v12_v0 }
   0x3   :  { %14 = vsyncpa [#allocation4], 0 }
   0x4   :  { %15 = vsyncpa [#allocation6], 0  ;;  %s890_s26 = smov [#allocation3]   ;;  %s842_s30 = scalar_lea.hbm %s1067_s0, 1024 }
   0x5   :  { %s21_s27 = sshll.u32 %s890_s26, 4  ;;  %p843_p0 = scmp.ne.s32.totalorder %s1067_s0, %s842_s30  ;;  %s22_s27 = int_to_ptr.vmem [resolvable:$true] %s21_s27 }
   0x6   :  { %p846_p1 = scmp.lt.u32.totalorder %s842_s30, %s1067_s0 }
   0x8   :  { %p848_p2 = pnand %p846_p1, %p843_p0 }
   0xa   :  { %851 = shalt.err (!%p848_p2)
}
   0xb   :  { %s852_s6 = scalar_lea.vmem %s22_s27, 1024  ;;  %p857_p4 = scmp.lt.s32.totalorder %s22_s27, %s22_s27 }
   0xc   :  { %p853_p3 = scmp.ne.s32.totalorder %s22_s27, %s852_s6  ;;  %p858_p5 = scmp.lt.s32.totalorder %s852_s6, %s852_s6 }
   0xe   :  { %p859_p6 = por %p858_p5, %p857_p4 }
  0x10   :  { %p860_p7 = pnand %p859_p6, %p853_p3 }
  0x12   :  { %863 = shalt.err (!%p860_p7)
}
  0x13   :  { %s891_s12 = smov 128   ;;  %s892_s13 = smov 8  }
  0x14   :  { %27 = dma.hbm_to_vmem [thread:$0]  %s1067_s0, 1024, %s22_s27, [#allocation4], %s891_s12, %s891_s12, %s892_s13  }
  0x15   :  { %s893_s16 = smov [#allocation5]   ;;  %s864_s20 = scalar_lea.hbm %s1068_s1, 3072 }
  0x16   :  { %s33_s17 = sshll.u32 %s893_s16, 4  ;;  %p865_p8 = scmp.ne.s32.totalorder %s1068_s1, %s864_s20  ;;  %s34_s17 = int_to_ptr.vmem [resolvable:$true] %s33_s17 }
  0x17   :  { %p868_p9 = scmp.lt.u32.totalorder %s864_s20, %s1068_s1 }
  0x19   :  { %p870_p10 = pnand %p868_p9, %p865_p8 }
  0x1b   :  { %873 = shalt.err (!%p870_p10)
}
  0x1c   :  { %s874_s25 = scalar_lea.vmem %s34_s17, 3072  ;;  %p879_p12 = scmp.lt.s32.totalorder %s34_s17, %s34_s17 }
  0x1d   :  { %p875_p11 = scmp.ne.s32.totalorder %s34_s17, %s874_s25  ;;  %p880_p13 = scmp.lt.s32.totalorder %s874_s25, %s874_s25 }
  0x1f   :  { %p881_p0 = por %p880_p13, %p879_p12 }
  0x21   :  { %p882_p1 = pnand %p881_p0, %p875_p11 }
  0x23   :  { %885 = shalt.err (!%p882_p1)
}
  0x24   :  { %s894_s0 = smov 768   ;;  %s895_s26 = smov 48  }
  0x25   :  { %39 = dma.hbm_to_vmem [thread:$0]  %s1068_s1, 3072, %s34_s17, [#allocation6], %s894_s0, %s894_s0, %s895_s26  }
  0x26   :  { %886 = dma.done.wait [#allocation4], 1024  }
  0x27   :  { %887 = vsyncadd [#allocation4], 4294966272 }
  0x28   :  { %888 = dma.done.wait [#allocation6], 3072  }
  0x29   :  { %889 = vsyncadd [#allocation6], 4294964224  ;;  %v896_v1 = vmov 0.0   ;;  %v65_v2 = vld [vmem:[#allocation5 + $0x8] sm:$0xff]  ;;  %v71_v3 = vld [vmem:[#allocation5 + $0x38] sm:$0xff]  ;;  %vm88_vm0 = vcmask 261120  }
  0x2a   :  { %177 = vmatprep.mubr.f32.mxu0 %v896_v1  ;;  %201 = vmatprep.mubr.f32.mxu1 %v896_v1  ;;  %v64_v4 = vld [vmem:[#allocation5] sm:$0xff]  ;;  %v803_v5 = vpack.c.bf16 %v71_v3, %v65_v2  ;;  %v70_v6 = vld [vmem:[#allocation5 + $0x30] sm:$0xff]  ;;  %v77_v7 = vld [vmem:[#allocation5 + $0x68] sm:$0xff]  ;;  %vm460_vm1 = vcmask 1046528   ;;  %vm489_vm2 = vcmask 408576   ;;  %vm491_vm3 = vcmask 407552  }
  0x2b   :  { %v83_v8 = vld [vmem:[#allocation5 + $0x98] sm:$0xff]  ;;  %v805_v9 = vpack.c.bf16 %v70_v6, %v64_v4  ;;  %v76_v11 = vld [vmem:[#allocation5 + $0x60] sm:$0xff]  ;;  %v82_v12 = vld [vmem:[#allocation5 + $0x90] sm:$0xff]  ;;  %vm582_vm4 = vcmask 1045504   ;;  %vm619_vm5 = vcmask 1044480   ;;  %vm649_vm6 = vcmask 405504  }
  0x2c   :  { %v807_v10 = vpack.c.bf16 %v83_v8, %v77_v7  ;;  %804 = vmatprep.subr.bf16.mxu0 %v803_v5  ;;  %827 = vmatprep.subr.bf16.mxu1 %v803_v5  ;;  %v67_v13 = vld [vmem:[#allocation5 + $0x18] sm:$0xff]  ;;  %v73_v14 = vld [vmem:[#allocation5 + $0x48] sm:$0xff]  ;;  %v809_v15 = vpack.c.bf16 %v82_v12, %v76_v11  ;;  %v66_v18 = vld [vmem:[#allocation5 + $0x10] sm:$0xff]  ;;  %vm712_vm7 = vcmask 1041409   ;;  %vm715_vm8 = vcmask 1042434  }
  0x2d   :  { %806 = vmatpush1.bf16.msra.mxu0 %v805_v9  ;;  %829 = vmatpush1.bf16.msra.mxu1 %v805_v9  ;;  %v69_v16 = vld [vmem:[#allocation5 + $0x28] sm:$0xff]  ;;  %v811_v17 = vpack.c.bf16 %v73_v14, %v67_v13  ;;  %v72_v19 = vld [vmem:[#allocation5 + $0x40] sm:$0xff]  ;;  %v75_v20 = vld [vmem:[#allocation5 + $0x58] sm:$0xff]  ;;  %vm718_vm9 = vcmask 1043459   ;;  %vm721_vm10 = vcmask 404480   ;;  %vm765_vm11 = vcmask 3072  }
  0x2e   :  { %808 = vmatprep.subr.bf16.mxu0 %v807_v10  ;;  %828 = vmatprep.subr.bf16.mxu1 %v807_v10  ;;  %v819_v21 = vpack.c.bf16 %v75_v20, %v69_v16  ;;  %v68_v22 = vld [vmem:[#allocation5 + $0x20] sm:$0xff]  ;;  %v74_v23 = vld [vmem:[#allocation5 + $0x50] sm:$0xff]  ;;  %v79_v24 = vld [vmem:[#allocation5 + $0x78] sm:$0xff]  ;;  %v813_v28 = vpack.c.bf16 %v72_v19, %v66_v18 }
  0x2f   :  { %v85_v25 = vld [vmem:[#allocation5 + $0xa8] sm:$0xff]  ;;  %v56_v26 = vld [vmem:[#allocation3] sm:$0xff]  ;;  %v821_v30 = vpack.c.bf16 %v74_v23, %v68_v22  ;;  %v78_v31 = vld [vmem:[#allocation5 + $0x70] sm:$0xff] }
  0x30   :  { %v60_v27 = vld [vmem:[#allocation3 + $0x20] sm:$0xff]  ;;  %v81_v29 = vld [vmem:[#allocation5 + $0x88] sm:$0xff]  ;;  %v87_v32 = vld [vmem:[#allocation5 + $0xb8] sm:$0xff]  ;;  %v815_v33 = vpack.c.bf16 %v85_v25, %v79_v24 }
  0x31   :  { %810 = vmatpush1.bf16.msra.mxu0 %v809_v15  ;;  %830 = vmatpush1.bf16.msra.mxu1 %v809_v15  ;;  %v84_v34 = vld [vmem:[#allocation5 + $0xa0] sm:$0xff]  ;;  %v823_v35 = vpack.c.bf16 %v87_v32, %v81_v29  ;;  %v86_v37 = vld [vmem:[#allocation5 + $0xb0] sm:$0xff]  ;;  %v57_v38 = vld [vmem:[#allocation3 + $0x8] sm:$0xff] }
  0x32   :  { %812 = vmatprep.subr.bf16.mxu1 %v811_v17  ;;  %820 = vmatprep.subr.bf16.mxu0 %v819_v21  ;;  %v80_v36 = vld [vmem:[#allocation5 + $0x80] sm:$0xff]  ;;  %v61_v39 = vld [vmem:[#allocation3 + $0x28] sm:$0xff]  ;;  %v817_v40 = vpack.c.bf16 %v84_v34, %v78_v31  ;;  %v58_v42 = vld [vmem:[#allocation3 + $0x10] sm:$0xff] }
  0x33   :  { %v825_v41 = vpack.c.bf16 %v86_v37, %v80_v36  ;;  %v62_v43 = vld [vmem:[#allocation3 + $0x30] sm:$0xff]  ;;  %v59_v44 = vld [vmem:[#allocation3 + $0x18] sm:$0xff] }
  0x34   :  { %773 = vmatmul.mubr.msk.f32.vlgmr.msra.gmra.mrb[0].mxu0 %vm88_vm0, %v56_v26  ;;  %777 = vmatmul.mubr.msk.f32.vlgmr.msra.gmra.mrb[0].mxu1 %vm88_vm0, %v60_v27  ;;  %v63_v45 = vld [vmem:[#allocation3 + $0x38] sm:$0xff] }
  0x35   :  { %814 = vmatpush1.bf16.msra.mxu1 %v813_v28  ;;  %183 = vmatprep.mubr.f32.mxu0 %v896_v1 }
  0x36   :  { %207 = vmatprep.mubr.f32.mxu1 %v896_v1  ;;  %822 = vmatpush1.bf16.msra.mxu0 %v821_v30 }
  0x37   :  { %816 = vmatprep.subr.bf16.mxu1 %v815_v33  ;;  %824 = vmatprep.subr.bf16.mxu0 %v823_v35 }
  0x38   :  { %774 = vmatmul.mubr.msk.f32.gmra.mrb[2].mxu0 %vm88_vm0, %v57_v38  ;;  %778 = vmatmul.mubr.msk.f32.gmra.mrb[2].mxu1 %vm88_vm0, %v61_v39 }
  0x39   :  { %189 = vmatprep.mubr.f32.mxu0 %v896_v1  ;;  %213 = vmatprep.mubr.f32.mxu1 %v896_v1 }
  0x3a   :  { %818 = vmatpush1.bf16.msra.mxu1 %v817_v40  ;;  %826 = vmatpush1.bf16.msra.mxu0 %v825_v41 }
  0x3c   :  { %775 = vmatmul.mubr.msk.f32.gmra.mrb[4].mxu0 %vm88_vm0, %v58_v42  ;;  %779 = vmatmul.mubr.msk.f32.gmra.mrb[4].mxu1 %vm88_vm0, %v62_v43 }
  0x3d   :  { %195 = vmatprep.mubr.f32.mxu0 %v896_v1  ;;  %219 = vmatprep.mubr.f32.mxu1 %v896_v1 }
  0x40   :  { %776 = vmatmul.mubr.msk.f32.gmra.mrb[6].mxu0 %vm88_vm0, %v59_v44  ;;  %780 = vmatmul.mubr.msk.f32.gmra.mrb[6].mxu1 %vm88_vm0, %v63_v45 }
  0x41   :  { %290 = vmatprep.mubr.f32.mxu1 %v896_v1  ;;  %403 = vmatprep.mubr.f32.mxu0 %v896_v1 }
  0x44   :  { %781 = vmatmul.mubr.msk.f32.vlgmr.msra.gmra.mrb[8].mxu1 %vm88_vm0, %v56_v26  ;;  %789 = vmatmul.mubr.msk.f32.vlgmr.msra.gmra.mrb[8].mxu0 %vm88_vm0, %v56_v26 }
  0x45   :  { %296 = vmatprep.mubr.f32.mxu1 %v896_v1  ;;  %409 = vmatprep.mubr.f32.mxu0 %v896_v1 }
  0x48   :  { %782 = vmatmul.mubr.msk.f32.gmra.mrb[10].mxu1 %vm88_vm0, %v57_v38  ;;  %790 = vmatmul.mubr.msk.f32.gmra.mrb[10].mxu0 %vm88_vm0, %v57_v38 }
  0x49   :  { %302 = vmatprep.mubr.f32.mxu1 %v896_v1  ;;  %415 = vmatprep.mubr.f32.mxu0 %v896_v1 }
  0x4c   :  { %783 = vmatmul.mubr.msk.f32.gmra.mrb[12].mxu1 %vm88_vm0, %v58_v42  ;;  %791 = vmatmul.mubr.msk.f32.gmra.mrb[12].mxu0 %vm88_vm0, %v58_v42 }
  0x4d   :  { %308 = vmatprep.mubr.f32.mxu1 %v896_v1  ;;  %421 = vmatprep.mubr.f32.mxu0 %v896_v1 }
  0x50   :  { %784 = vmatmul.mubr.msk.f32.gmra.mrb[14].mxu1 %vm88_vm0, %v59_v44  ;;  %792 = vmatmul.mubr.msk.f32.gmra.mrb[14].mxu0 %vm88_vm0, %v59_v44 }
  0x51   :  { %314 = vmatprep.mubr.f32.mxu1 %v896_v1  ;;  %427 = vmatprep.mubr.f32.mxu0 %v896_v1 }
  0x54   :  { %785 = vmatmul.mubr.msk.f32.gmra.mrb[16].mxu1 %vm88_vm0, %v60_v27  ;;  %793 = vmatmul.mubr.msk.f32.gmra.mrb[16].mxu0 %vm88_vm0, %v60_v27 }
  0x55   :  { %320 = vmatprep.mubr.f32.mxu1 %v896_v1  ;;  %433 = vmatprep.mubr.f32.mxu0 %v896_v1 }
  0x58   :  { %786 = vmatmul.mubr.msk.f32.gmra.mrb[18].mxu1 %vm88_vm0, %v61_v39  ;;  %794 = vmatmul.mubr.msk.f32.gmra.mrb[18].mxu0 %vm88_vm0, %v61_v39 }
  0x59   :  { %326 = vmatprep.mubr.f32.mxu1 %v896_v1  ;;  %439 = vmatprep.mubr.f32.mxu0 %v896_v1 }
  0x5c   :  { %787 = vmatmul.mubr.msk.f32.gmra.mrb[20].mxu1 %vm88_vm0, %v62_v43  ;;  %795 = vmatmul.mubr.msk.f32.gmra.mrb[20].mxu0 %vm88_vm0, %v62_v43 }
  0x5d   :  { %332 = vmatprep.mubr.f32.mxu1 %v896_v1  ;;  %445 = vmatprep.mubr.f32.mxu0 %v896_v1 }
  0x60   :  { %788 = vmatmul.mubr.msk.f32.gmra.mrb[22].mxu1 %vm88_vm0, %v63_v45  ;;  %796 = vmatmul.mubr.msk.f32.gmra.mrb[22].mxu0 %vm88_vm0, %v63_v45 }
 0x107   :  { %v203_v46 = vpop.f32.mrb[0].mxu1  ;;  %v179_v47 = vpop.f32.mrb[0].mxu0 }
 0x108   :  { %v205_v48 = vpop.f32.mrb[1].mxu1  ;;  %v181_v49 = vpop.f32.mrb[1].mxu0 }
 0x109   :  { %v467_v54 = vrot.slane %v205_v48, 1  ;;  %v461_v55 = vrot.slane %v181_v49, 1 }
 0x10b   :  { %v185_v50 = vpop.f32.mrb[2].mxu0  ;;  %v209_v51 = vpop.f32.mrb[2].mxu1 }
 0x10c   :  { %v187_v52 = vpop.f32.mrb[3].mxu0  ;;  %v211_v53 = vpop.f32.mrb[3].mxu1 }
 0x10d   :  { %v462_v56 = vrot.slane %v187_v52, 1  ;;  %v468_v57 = vrot.slane %v211_v53, 1 }
 0x10f   :  { %v463_v58 = vsel %vm460_vm1, %v461_v55, %v462_v56  ;;  %v482_v59 = vadd.f32 %v462_v56, %v185_v50  ;;  %v469_v60 = vsel %vm460_vm1, %v467_v54, %v468_v57  ;;  %v486_v61 = vadd.f32 %v468_v57, %v209_v51  ;;  %v215_v62 = vpop.f32.mrb[4].mxu1  ;;  %v191_v63 = vpop.f32.mrb[4].mxu0 }
 0x110   :  { %v481_v0 = vadd.f32 %v463_v58, %v179_v47  ;;  %v485_v1 = vadd.f32 %v469_v60, %v203_v46  ;;  %v217_v2 = vpop.f32.mrb[5].mxu1  ;;  %v193_v3 = vpop.f32.mrb[5].mxu0 }
 0x111   :  { %v492_v4 = vsel %vm491_vm3, %v482_v59, -inf  ;;  %v510_v5 = vsel %vm491_vm3, %v486_v61, -inf  ;;  %v464_v12 = vrot.slane %v193_v3, 1  ;;  %v470_v19 = vrot.slane %v217_v2, 1 }
 0x112   :  { %v490_v6 = vsel %vm489_vm2, %v481_v0, -inf  ;;  %v509_v7 = vsel %vm489_vm2, %v485_v1, -inf }
 0x113   :  { %v493_v8 = vmax.f32 %v490_v6, %v492_v4  ;;  %v511_v9 = vmax.f32 %v509_v7, %v510_v5  ;;  %v197_v10 = vpop.f32.mrb[6].mxu0  ;;  %v221_v11 = vpop.f32.mrb[6].mxu1 }
 0x114   :  { %v199_v13 = vpop.f32.mrb[7].mxu0  ;;  %v223_v14 = vpop.f32.mrb[7].mxu1 }
 0x115   :  { %v494_v15 = vrot.slane %v493_v8, 4  ;;  %v512_v16 = vrot.slane %v511_v9, 4  ;;  %v465_v17 = vrot.slane %v199_v13, 1  ;;  %v471_v18 = vrot.slane %v223_v14, 1 }
 0x117   :  { %v495_v20 = vmax.f32 %v493_v8, %v494_v15  ;;  %v513_v21 = vmax.f32 %v511_v9, %v512_v16  ;;  %v466_v22 = vsel %vm460_vm1, %v464_v12, %v465_v17  ;;  %v484_v23 = vadd.f32 %v465_v17, %v197_v10  ;;  %v292_v24 = vpop.f32.mrb[8].mxu1  ;;  %v405_v25 = vpop.f32.mrb[8].mxu0  ;;  %v797_v9 = vld [vmem:[%s1069_s2] ss:$0 sm:$0xff] }
 0x118   :  { %v483_v26 = vadd.f32 %v466_v22, %v191_v63  ;;  %v472_v27 = vsel %vm460_vm1, %v470_v19, %v471_v18  ;;  %v488_v28 = vadd.f32 %v471_v18, %v221_v11  ;;  %v294_v29 = vpop.f32.mrb[9].mxu1  ;;  %v407_v30 = vpop.f32.mrb[9].mxu0  ;;  %v583_v37 = vrot.slane %v405_v25, 2 }
 0x119   :  { %v496_v31 = vrot.slane %v495_v20, 2  ;;  %v514_v32 = vrot.slane %v513_v21, 2  ;;  %v501_v33 = vsel %vm491_vm3, %v484_v23, -inf  ;;  %v487_v34 = vadd.f32 %v472_v27, %v215_v62 }
 0x11a   :  { %v500_v35 = vsel %vm489_vm2, %v483_v26, -inf  ;;  %v519_v36 = vsel %vm491_vm3, %v488_v28, -inf  ;;  %v546_v50 = vrot.slane %v294_v29, 1  ;;  %v620_v53 = vrot.slane %v407_v30, 3  ;;  %v799_v30 = vld [vmem:[%s1071_s4] ss:$0 sm:$0xff] }
 0x11b   :  { %v497_v38 = vmax.f32 %v495_v20, %v496_v31  ;;  %v515_v39 = vmax.f32 %v513_v21, %v514_v32  ;;  %v502_v40 = vmax.f32 %v500_v35, %v501_v33  ;;  %v518_v41 = vsel %vm489_vm2, %v487_v34, -inf  ;;  %v298_v42 = vpop.f32.mrb[10].mxu1  ;;  %v411_v43 = vpop.f32.mrb[10].mxu0 }
 0x11c   :  { %v520_v44 = vmax.f32 %v518_v41, %v519_v36  ;;  %v584_v45 = vrot.slane %v411_v43, 2  ;;  %v300_v46 = vpop.f32.mrb[11].mxu1  ;;  %v413_v47 = vpop.f32.mrb[11].mxu0 }
 0x11d   :  { %v498_v48 = vrot.slane %v497_v38, 1  ;;  %v503_v49 = vrot.slane %v502_v40, 4  ;;  %v547_v51 = vrot.slane %v300_v46, 1  ;;  %v621_v55 = vrot.slane %v413_v47, 3 }
 0x11e   :  { %v521_v52 = vrot.slane %v520_v44, 4  ;;  %v585_v54 = vsel %vm582_vm4, %v583_v37, %v584_v45  ;;  %v516_v56 = vrot.slane %v515_v39, 1 }
 0x11f   :  { %v504_v57 = vmax.f32 %v502_v40, %v503_v49  ;;  %v548_v58 = vsel %vm460_vm1, %v546_v50, %v547_v51  ;;  %v304_v59 = vpop.f32.mrb[12].mxu1  ;;  %v417_v60 = vpop.f32.mrb[12].mxu0  ;;  %v567_v63 = vadd.f32 %v547_v51, %v298_v42  ;;  %v622_v0 = vsel %vm619_vm5, %v620_v53, %v621_v55 }
 0x120   :  { %v522_v61 = vmax.f32 %v520_v44, %v521_v52  ;;  %v566_v62 = vadd.f32 %v548_v58, %v292_v24  ;;  %v306_v1 = vpop.f32.mrb[13].mxu1  ;;  %v419_v2 = vpop.f32.mrb[13].mxu0  ;;  %v499_v3 = vmax.f32 %v497_v38, %v498_v48  ;;  %v586_v8 = vrot.slane %v417_v60, 2 }
 0x121   :  { %v505_v4 = vrot.slane %v504_v57, 2  ;;  %v604_v7 = vadd.f32 %v584_v45, %v567_v63  ;;  %v517_v10 = vmax.f32 %v515_v39, %v516_v56  ;;  %v549_v12 = vrot.slane %v306_v1, 1 }
 0x122   :  { %v523_v5 = vrot.slane %v522_v61, 2  ;;  %v603_v6 = vadd.f32 %v585_v54, %v566_v62  ;;  %v623_v13 = vrot.slane %v419_v2, 3  ;;  %v534_v25 = vadd.f32 %v797_v9, %v499_v3 }
 0x123   :  { %v506_v11 = vmax.f32 %v504_v57, %v505_v4  ;;  %v310_v14 = vpop.f32.mrb[14].mxu1  ;;  %v423_v15 = vpop.f32.mrb[14].mxu0  ;;  %v641_v18 = vadd.f32 %v621_v55, %v604_v7  ;;  %v536_v42 = vadd.f32 %v797_v9, %v517_v10 }
 0x124   :  { %v524_v16 = vmax.f32 %v522_v61, %v523_v5  ;;  %v640_v17 = vadd.f32 %v622_v0, %v603_v6  ;;  %v587_v19 = vrot.slane %v423_v15, 2  ;;  %v312_v20 = vpop.f32.mrb[15].mxu1  ;;  %v425_v21 = vpop.f32.mrb[15].mxu0  ;;  %v703_v45 = vmul.f32 %v799_v30, %v534_v25 }
 0x125   :  { %v507_v22 = vrot.slane %v506_v11, 1  ;;  %v550_v23 = vrot.slane %v312_v20, 1  ;;  %v624_v24 = vrot.slane %v425_v21, 3  ;;  %v650_v28 = vsel %vm649_vm6, %v641_v18, -inf }
 0x126   :  { %v525_v26 = vrot.slane %v524_v16, 1  ;;  %v648_v27 = vsel %vm489_vm2, %v640_v17, -inf  ;;  %v588_v29 = vsel %vm582_vm4, %v586_v8, %v587_v19  ;;  %v705_v61 = vmul.f32 %v799_v30, %v536_v42 }
 0x127   :  { %v508_v31 = vmax.f32 %v506_v11, %v507_v22  ;;  %v651_v32 = vmax.f32 %v648_v27, %v650_v28  ;;  %v551_v33 = vsel %vm460_vm1, %v549_v12, %v550_v23  ;;  %v569_v34 = vadd.f32 %v550_v23, %v310_v14  ;;  %v316_v35 = vpop.f32.mrb[16].mxu1  ;;  %v429_v36 = vpop.f32.mrb[16].mxu0 }
 0x128   :  { %v568_v37 = vadd.f32 %v551_v33, %v304_v59  ;;  %v625_v38 = vsel %vm619_vm5, %v623_v13, %v624_v24  ;;  %v318_v39 = vpop.f32.mrb[17].mxu1  ;;  %v431_v40 = vpop.f32.mrb[17].mxu0  ;;  %v526_v41 = vmax.f32 %v524_v16, %v525_v26  ;;  %v589_v47 = vrot.slane %v429_v36, 2 }
 0x129   :  { %v652_v43 = vrot.slane %v651_v32, 4  ;;  %v606_v44 = vadd.f32 %v587_v19, %v569_v34  ;;  %v535_v48 = vadd.f32 %v797_v9, %v508_v31  ;;  %v552_v52 = vrot.slane %v318_v39, 1 }
 0x12a   :  { %v605_v46 = vadd.f32 %v588_v29, %v568_v37  ;;  %v537_v49 = vadd.f32 %v797_v9, %v526_v41  ;;  %v626_v53 = vrot.slane %v431_v40, 3  ;;  %v714_v17 = vrot.slane %v705_v61, 6 }
 0x12b   :  { %v653_v50 = vmax.f32 %v651_v32, %v652_v43  ;;  %v643_v51 = vadd.f32 %v624_v24, %v606_v44  ;;  %v322_v54 = vpop.f32.mrb[18].mxu1  ;;  %v435_v55 = vpop.f32.mrb[18].mxu0  ;;  %v704_v60 = vmul.f32 %v799_v30, %v535_v48 }
 0x12c   :  { %v642_v56 = vadd.f32 %v625_v38, %v605_v46  ;;  %v590_v57 = vrot.slane %v435_v55, 2  ;;  %v324_v58 = vpop.f32.mrb[19].mxu1  ;;  %v437_v59 = vpop.f32.mrb[19].mxu0  ;;  %v706_v4 = vmul.f32 %v799_v30, %v537_v49 }
 0x12d   :  { %v654_v62 = vrot.slane %v653_v50, 2  ;;  %v659_v63 = vsel %vm649_vm6, %v643_v51, -inf  ;;  %v553_v0 = vrot.slane %v324_v58, 1  ;;  %v627_v1 = vrot.slane %v437_v59, 3 }
 0x12e   :  { %v658_v2 = vsel %vm489_vm2, %v642_v56, -inf  ;;  %v591_v3 = vsel %vm582_vm4, %v589_v47, %v590_v57  ;;  %v711_v5 = vrot.slane %v704_v60, 7  ;;  %v717_v23 = vrot.slane %v706_v4, 5 }
 0x12f   :  { %v655_v6 = vmax.f32 %v653_v50, %v654_v62  ;;  %v660_v7 = vmax.f32 %v658_v2, %v659_v63  ;;  %v554_v8 = vsel %vm460_vm1, %v552_v52, %v553_v0  ;;  %v571_v9 = vadd.f32 %v553_v0, %v322_v54  ;;  %v328_v10 = vpop.f32.mrb[20].mxu1  ;;  %v441_v11 = vpop.f32.mrb[20].mxu0  ;;  %v798_v54 = vld [vmem:[%s1070_s3] ss:$0 sm:$0xff] }
 0x130   :  { %v570_v12 = vadd.f32 %v554_v8, %v316_v35  ;;  %v628_v13 = vsel %vm619_vm5, %v626_v53, %v627_v1  ;;  %v330_v14 = vpop.f32.mrb[21].mxu1  ;;  %v443_v15 = vpop.f32.mrb[21].mxu0  ;;  %v713_v16 = vsel %vm712_vm7, %v711_v5, %v703_v45  ;;  %v592_v21 = vrot.slane %v441_v11, 2  ;;  %v800_v0 = vld [vmem:[%s1072_s5] ss:$0 sm:$0xff] }
 0x131   :  { %v661_v18 = vrot.slane %v660_v7, 4  ;;  %v608_v19 = vadd.f32 %v590_v57, %v571_v9  ;;  %v716_v22 = vsel %vm715_vm8, %v714_v17, %v713_v16  ;;  %v656_v24 = vrot.slane %v655_v6, 1 }
 0x132   :  { %v607_v20 = vadd.f32 %v591_v3, %v570_v12  ;;  %v555_v30 = vrot.slane %v330_v14, 1  ;;  %v719_v31 = vsel %vm718_vm9, %v717_v23, %v716_v22  ;;  %v629_v40 = vrot.slane %v443_v15, 3 }
 0x133   :  { %v662_v25 = vmax.f32 %v660_v7, %v661_v18  ;;  %v645_v26 = vadd.f32 %v627_v1, %v608_v19  ;;  %v334_v27 = vpop.f32.mrb[22].mxu1  ;;  %v447_v28 = vpop.f32.mrb[22].mxu0  ;;  %v722_v37 = vsel %vm721_vm10, %v719_v31, 0.0  ;;  %v657_v49 = vmax.f32 %v655_v6, %v656_v24 }
 0x134   :  { %v644_v29 = vadd.f32 %v628_v13, %v607_v20  ;;  %v593_v32 = vrot.slane %v447_v28, 2  ;;  %v336_v33 = vpop.f32.mrb[23].mxu1  ;;  %v449_v34 = vpop.f32.mrb[23].mxu0  ;;  %723 = vadd.xlane.f32.xlu0 %v722_v37 }
 0x135   :  { %v663_v35 = vrot.slane %v662_v25, 2  ;;  %v668_v36 = vsel %vm649_vm6, %v645_v26, -inf  ;;  %v556_v38 = vrot.slane %v336_v33, 1  ;;  %v630_v42 = vrot.slane %v449_v34, 3 }
 0x136   :  { %v667_v39 = vsel %vm489_vm2, %v644_v29, -inf  ;;  %v594_v41 = vsel %vm582_vm4, %v592_v21, %v593_v32  ;;  %v692_v61 = vadd.f32 %v798_v54, %v657_v49 }
 0x137   :  { %v664_v43 = vmax.f32 %v662_v25, %v663_v35  ;;  %v669_v44 = vmax.f32 %v667_v39, %v668_v36  ;;  %v557_v45 = vsel %vm460_vm1, %v555_v30, %v556_v38  ;;  %v573_v46 = vadd.f32 %v556_v38, %v334_v27  ;;  %v801_v25 = vld [vmem:[#allocation2] ss:$0 sm:$0xff] }
 0x138   :  { %v572_v47 = vadd.f32 %v557_v45, %v328_v10  ;;  %v631_v48 = vsel %vm619_vm5, %v629_v40, %v630_v42  ;;  %v732_v6 = vmul.f32 %v800_v0, %v692_v61 }
 0x139   :  { %v665_v50 = vrot.slane %v664_v43, 1  ;;  %v670_v51 = vrot.slane %v669_v44, 4  ;;  %v610_v52 = vadd.f32 %v593_v32, %v573_v46 }
 0x13a   :  { %v609_v53 = vadd.f32 %v594_v41, %v572_v47 }
 0x13b   :  { %v666_v55 = vmax.f32 %v664_v43, %v665_v50  ;;  %v671_v56 = vmax.f32 %v669_v44, %v670_v51  ;;  %v647_v57 = vadd.f32 %v630_v42, %v610_v52 }
 0x13c   :  { %v646_v58 = vadd.f32 %v631_v48, %v609_v53 }
 0x13d   :  { %v672_v59 = vrot.slane %v671_v56, 2  ;;  %v677_v60 = vsel %vm649_vm6, %v647_v57, -inf  ;;  %v693_v62 = vadd.f32 %v798_v54, %v666_v55 }
 0x13e   :  { %v676_v63 = vsel %vm489_vm2, %v646_v58, -inf }
 0x13f   :  { %v673_v1 = vmax.f32 %v671_v56, %v672_v59  ;;  %v678_v2 = vmax.f32 %v676_v63, %v677_v60  ;;  %v733_v3 = vmul.f32 %v800_v0, %v693_v62 }
 0x141   :  { %v674_v4 = vrot.slane %v673_v1, 1  ;;  %v679_v5 = vrot.slane %v678_v2, 4  ;;  %v740_v7 = vrot.slane %v733_v3, 7 }
 0x143   :  { %v675_v8 = vmax.f32 %v673_v1, %v674_v4  ;;  %v680_v9 = vmax.f32 %v678_v2, %v679_v5  ;;  %v741_v10 = vsel %vm712_vm7, %v740_v7, %v732_v6 }
 0x145   :  { %v681_v11 = vrot.slane %v680_v9, 2  ;;  %v694_v12 = vadd.f32 %v798_v54, %v675_v8 }
 0x147   :  { %v682_v13 = vmax.f32 %v680_v9, %v681_v11  ;;  %v734_v14 = vmul.f32 %v800_v0, %v694_v12 }
 0x149   :  { %v683_v15 = vrot.slane %v682_v13, 1  ;;  %v742_v16 = vrot.slane %v734_v14, 6 }
 0x14b   :  { %v684_v17 = vmax.f32 %v682_v13, %v683_v15  ;;  %v743_v18 = vsel %vm715_vm8, %v742_v16, %v741_v10 }
 0x14d   :  { %v695_v19 = vadd.f32 %v798_v54, %v684_v17 }
 0x14f   :  { %v735_v20 = vmul.f32 %v800_v0, %v695_v19 }
 0x151   :  { %v744_v21 = vrot.slane %v735_v20, 5 }
 0x153   :  { %v745_v22 = vsel %vm718_vm9, %v744_v21, %v743_v18 }
 0x154   :  { %v747_v23 = vsel %vm721_vm10, %v745_v22, 0.0 }
 0x155   :  { %748 = vadd.xlane.f32.xlu0 %v747_v23 }
 0x1c1   :  { %v724_v24 = vpop.xlane.xlu0 %723 }
 0x1e2   :  { %v749_v26 = vpop.xlane.xlu0 %748 }
 0x1e3   :  { %v750_v27 = vadd.f32 %v749_v26, %v724_v24 }
 0x1e5   :  { %v758_v28 = vadd.f32 %v801_v25, %v750_v27 }
 0x1e7   :  { %v802_v29 = vmul.f32 -1.442695, %v758_v28 }
 0x1e9   :  { %838 = vpow2.f32 %v802_v29 }
 0x1f3   :  { %v839_v30 = vpop.eup %838 }
 0x1f4   :  { %v762_v31 = vadd.f32 1.0, %v839_v30 }
 0x1f6   :  { %840 = vrcp.f32 %v762_v31 }
 0x200   :  { %v841_v32 = vpop.eup %840 }
 0x201   :  { %766 = vst.msk [vmem:[%s1074_s7] sm:$0xf] %vm765_vm11, %v841_v32 }
 0x202   :  { %771 = vsyncpa [#allocation4], 1 }
 0x203   :  { %772 = vsyncpa [#allocation6], 1 }

</bundles_post_ra>
